<compile_context>
chip_gen: v7x
topology: tpu7x:2x2x1
jax: 0.10.0
libtpu: 0.0.40
codegen_flags: <defaults>
</compile_context>

<pallas_src>
import jax
import jax.numpy as jnp
from jax.experimental import pallas as pl
from jax.experimental.pallas import tpu as pltpu

_INV_SQRT2 = 0.7071067811865476


def _gelu(x):
    # exact GELU (erf form) — matches torch.nn.GELU() default.
    return 0.5 * x * (1.0 + jax.lax.erf(x * _INV_SQRT2))


def _bw_linker_kernel(x_ref, wsf_ref, bsf_ref,
                      w1_ref, b1_ref, w2_ref, b2_ref, w3_ref, b3_ref,
                      wtf_ref, btf_ref, o_ref):
    """One grid step == one batch element.

    Layout: channels / unfolded conv taps live on sublanes, time lives on
    lanes.  The time axis was permuted on the host (lane order k1,k2,k3,j3) so
    each stride-5 stage's taps are contiguous lane blocks -> each conv is one
    matmul with taps folded into the contraction.
    """
    T = x_ref.shape[2]
    C = wsf_ref.shape[0]
    K = wtf_ref.shape[1] // C
    T_out = o_ref.shape[2]

    # --- spatial filter: Conv1d(k=1) == channel-mixing matmul over Cin only --
    h = jnp.dot(wsf_ref[...], x_ref[0],
                preferred_element_type=jnp.float32) + bsf_ref[...]        # (C, T)

    # --- pyramidal subsampling: 3 x (GELU -> Conv1d(k=5, stride=5)) ----------
    lanes = T
    for w_ref, b_ref in ((w1_ref, b1_ref), (w2_ref, b2_ref), (w3_ref, b3_ref)):
        g = _gelu(h)
        lanes //= 5
        # tap k of this stage == contiguous lane block [k*lanes, (k+1)*lanes)
        u = jnp.concatenate([g[:, k * lanes:(k + 1) * lanes] for k in range(5)],
                            axis=0)                                       # (5C, lanes)
        h = jnp.dot(w_ref[...], u,
                    preferred_element_type=jnp.float32) + b_ref[...]     # (C, lanes)

    # --- temporal filter: valid Conv1d(kernel=K) as one (R, K*C) matmul ------
    g = _gelu(h)                                                          # (C, T3)
    u = jnp.concatenate([g[:, k:k + T_out] for k in range(K)], axis=0)    # (K*C, T_out)
    o_ref[0] = jnp.dot(wtf_ref[...], u,
                       preferred_element_type=jnp.float32) + btf_ref[...]  # (R, T_out)


def _unfold_w(w):
    # torch Conv1d weight (C_out, C_in, k) -> (C_out, k*C_in): tap index slow,
    # matching the sublane order of the in-kernel unfold.
    return jnp.transpose(w, (0, 2, 1)).reshape(w.shape[0], -1)


@jax.jit
def brain_wave_linker_pallas(x_nct, params):
    """x_nct: (B, Cin, T) float32 (torch NCW). params: torch-layout weights.
    Returns (B, R, T_fmri) float32 (torch NCW). Dropout == identity (eval)."""
    B, Cin, T = x_nct.shape
    C = params['w_sf'].shape[0]
    R, _, K = params['w_tf'].shape
    assert T % 125 == 0, "EEG length must be divisible by 5*5*5"
    T3 = T // 125
    T_out = T3 - K + 1
    assert T_out >= 1, "temporal filter kernel longer than subsampled signal"

    # Time-axis permutation (base-5 digit reversal within each 125-sample
    # group): lane order becomes (k1, k2, k3, j3) so every stage's taps are
    # contiguous lane slices.  Channel count untouched (no sublane blow-up);
    # allow_input_fusion below lets XLA fuse this transpose into the kernel's
    # input DMA rather than materializing a second copy of x in HBM.
    x_perm = x_nct.reshape(B, Cin, T3, 5, 5, 5)            # [b, c, j3, k3, k2, k1]
    x_perm = jnp.transpose(x_perm, (0, 1, 5, 4, 3, 2)).reshape(B, Cin, T)

    wsf = params['w_sf'][:, :, 0]                          # (C, Cin), k=1 conv
    bsf = params['b_sf'].reshape(C, 1)
    w1, b1 = _unfold_w(params['w_p1']), params['b_p1'].reshape(C, 1)
    w2, b2 = _unfold_w(params['w_p2']), params['b_p2'].reshape(C, 1)
    w3, b3 = _unfold_w(params['w_p3']), params['b_p3'].reshape(C, 1)
    wtf, btf = _unfold_w(params['w_tf']), params['b_tf'].reshape(R, 1)

    def const(shape):
        n = len(shape)
        return pl.BlockSpec(shape, lambda b, _n=n: (0,) * _n)   # weights stay resident

    # Explicit VMEM budget: double-buffered x block + intermediate headroom.
    pad = lambda a, m: ((a + m - 1) // m) * m
    blk_bytes = 4 * (pad(Cin, 8) + 8 * pad(C, 8)) * pad(T, 128)
    vmem_limit = int(min(64 << 20, max(32 << 20, 2 * blk_bytes)))

    cost = pl.CostEstimate(
        flops=2 * B * (C * Cin * T
                       + 5 * C * C * (T // 5 + T // 25 + T // 125)
                       + K * C * R * T_out),
        transcendentals=B * C * (T + T // 5 + T // 25 + T // 125),
        bytes_accessed=4 * (B * Cin * T + B * R * T_out
                            + C * Cin + 15 * C * C + K * C * R + 4 * C + R),
    )

    return pl.pallas_call(
        _bw_linker_kernel,
        out_shape=jax.ShapeDtypeStruct((B, R, T_out), jnp.float32),
        grid=(B,),
        in_specs=[pl.BlockSpec((1, Cin, T), lambda b: (b, 0, 0)),
                  const(wsf.shape), const(bsf.shape),
                  const(w1.shape), const(b1.shape),
                  const(w2.shape), const(b2.shape),
                  const(w3.shape), const(b3.shape),
                  const(wtf.shape), const(btf.shape)],
        out_specs=pl.BlockSpec((1, R, T_out), lambda b: (b, 0, 0)),
        compiler_params=pltpu.CompilerParams(
            dimension_semantics=("parallel",),
            allow_input_fusion=[True] + [False] * 10,
            vmem_limit_bytes=vmem_limit),
        cost_estimate=cost,
    )(x_perm, wsf, bsf, w1, b1, w2, b2, w3, b3, wtf, btf)


if __name__ == "__main__":
    # small shapes consistent with the module
    B, Cin, R, K = 2, 4, 8, 4      # batch, EEG channels, ROIs, temporal kernel
    C = R                          # intermediate_channels = out_channels (None case)
    T = 1000                       # EEG samples -> 1000/125 = 8 fMRI-rate samples

    key = jax.random.PRNGKey(0)
    ks = jax.random.split(key, 11)
    x = jax.random.normal(ks[0], (B, Cin, T), dtype=jnp.float32)

    # torch-layout parameters (Conv1d weight: (out, in, kernel))
    params = {
        'w_sf': 0.30 * jax.random.normal(ks[1], (C, Cin, 1), dtype=jnp.float32),
        'b_sf': 0.10 * jax.random.normal(ks[2], (C,), dtype=jnp.float32),
        'w_p1': 0.20 * jax.random.normal(ks[3], (C, C, 5), dtype=jnp.float32),
        'b_p1': 0.10 * jax.random.normal(ks[4], (C,), dtype=jnp.float32),
        'w_p2': 0.20 * jax.random.normal(ks[5], (C, C, 5), dtype=jnp.float32),
        'b_p2': 0.10 * jax.random.normal(ks[6], (C,), dtype=jnp.float32),
        'w_p3': 0.20 * jax.random.normal(ks[7], (C, C, 5), dtype=jnp.float32),
        'b_p3': 0.10 * jax.random.normal(ks[8], (C,), dtype=jnp.float32),
        'w_tf': 0.25 * jax.random.normal(ks[9], (R, C, K), dtype=jnp.float32),
        'b_tf': 0.10 * jax.random.normal(ks[10], (R,), dtype=jnp.float32),
    }

    out = jax.block_until_ready(brain_wave_linker_pallas(x, params))

    # plain-JAX reference with PyTorch NCW conv semantics (eval-mode dropout)
    def conv1d(h, w, b, stride):
        y = jax.lax.conv_general_dilated(
            h, w, (stride,), 'VALID',
            dimension_numbers=('NCH', 'OIH', 'NCH'),
            precision=jax.lax.Precision.HIGHEST)
        return y + b[None, :, None]

    g = lambda v: jax.nn.gelu(v, approximate=False)
    ref = conv1d(x, params['w_sf'], params['b_sf'], 1)
    for wt, bt in (('w_p1', 'b_p1'), ('w_p2', 'b_p2'), ('w_p3', 'b_p3')):
        ref = conv1d(g(ref), params[wt], params[bt], 5)
    ref = conv1d(g(ref), params['w_tf'], params['b_tf'], 1)     # (B, R, T_fmri)

    assert out.shape == (B, R, (T // 125) - K + 1), out.shape
    err = float(jnp.max(jnp.abs(out - ref)))
    assert err < 5e-4, err
    print("KERNEL_OK")
</pallas_src>

<mosaic_0001>
module attributes {stable_mosaic.version = 11 : i64} {
  func.func @_bw_linker_kernel(%arg0: i32, %arg1: memref<1x4x1000xf32, #tpu.memory_space<vmem>>, %arg2: memref<8x4xf32, #tpu.memory_space<vmem>>, %arg3: memref<8x1xf32, #tpu.memory_space<vmem>>, %arg4: memref<8x40xf32, #tpu.memory_space<vmem>>, %arg5: memref<8x1xf32, #tpu.memory_space<vmem>>, %arg6: memref<8x40xf32, #tpu.memory_space<vmem>>, %arg7: memref<8x1xf32, #tpu.memory_space<vmem>>, %arg8: memref<8x40xf32, #tpu.memory_space<vmem>>, %arg9: memref<8x1xf32, #tpu.memory_space<vmem>>, %arg10: memref<8x32xf32, #tpu.memory_space<vmem>>, %arg11: memref<8x1xf32, #tpu.memory_space<vmem>>, %arg12: memref<1x8x5xf32, #tpu.memory_space<vmem>>) attributes {dimension_semantics = [#tpu.dimension_semantics<parallel>], iteration_bounds = array<i64: 2>, scalar_prefetch = 0 : i64, scratch_operands = 0 : i64, tpu.core_type = #tpu.core_type<tc>, window_params = [{transform_indices = @transform_0, window_bounds = array<i64: 1, 4, 1000>}, {pipeline_mode = #tpu.pipeline_mode<synchronous>, transform_indices = @transform_1, window_bounds = array<i64: 8, 4>}, {pipeline_mode = #tpu.pipeline_mode<synchronous>, transform_indices = @transform_2, window_bounds = array<i64: 8, 1>}, {pipeline_mode = #tpu.pipeline_mode<synchronous>, transform_indices = @transform_3, window_bounds = array<i64: 8, 40>}, {pipeline_mode = #tpu.pipeline_mode<synchronous>, transform_indices = @transform_4, window_bounds = array<i64: 8, 1>}, {pipeline_mode = #tpu.pipeline_mode<synchronous>, transform_indices = @transform_5, window_bounds = array<i64: 8, 40>}, {pipeline_mode = #tpu.pipeline_mode<synchronous>, transform_indices = @transform_6, window_bounds = array<i64: 8, 1>}, {pipeline_mode = #tpu.pipeline_mode<synchronous>, transform_indices = @transform_7, window_bounds = array<i64: 8, 40>}, {pipeline_mode = #tpu.pipeline_mode<synchronous>, transform_indices = @transform_8, window_bounds = array<i64: 8, 1>}, {pipeline_mode = #tpu.pipeline_mode<synchronous>, transform_indices = @transform_9, window_bounds = array<i64: 8, 32>}, {pipeline_mode = #tpu.pipeline_mode<synchronous>, transform_indices = @transform_10, window_bounds = array<i64: 8, 1>}, {transform_indices = @transform_11, window_bounds = array<i64: 1, 8, 5>}]} {
    %c0 = arith.constant 0 : index
    %c0_0 = arith.constant 0 : index
    %0 = vector.load %arg2[%c0, %c0_0] : memref<8x4xf32, #tpu.memory_space<vmem>>, vector<8x4xf32>
    %c0_1 = arith.constant 0 : index
    %c0_2 = arith.constant 0 : index
    %c0_3 = arith.constant 0 : index
    %1 = vector.load %arg1[%c0_1, %c0_2, %c0_3] : memref<1x4x1000xf32, #tpu.memory_space<vmem>>, vector<1x4x1000xf32>
    %2 = vector.shape_cast %1 : vector<1x4x1000xf32> to vector<4x1000xf32>
    %cst = arith.constant dense<0.000000e+00> : vector<8x1000xf32>
    %3 = tpu.matmul %0, %2, %cst {dimension_numbers = #tpu.dot_dimension_numbers<[1], [0], [0], [1], [0, 0, 1, 1], [], []>} : vector<8x4xf32>, vector<4x1000xf32>, vector<8x1000xf32> -> vector<8x1000xf32>
    %c0_4 = arith.constant 0 : index
    %c0_5 = arith.constant 0 : index
    %4 = vector.load %arg3[%c0_4, %c0_5] : memref<8x1xf32, #tpu.memory_space<vmem>>, vector<8x1xf32>
    %5 = vector.broadcast %4 : vector<8x1xf32> to vector<8x1000xf32>
    %6 = arith.addf %3, %5 : vector<8x1000xf32>
    %cst_6 = arith.constant 5.000000e-01 : f32
    %7 = vector.broadcast %cst_6 : f32 to vector<8x1000xf32>
    %8 = arith.mulf %7, %6 : vector<8x1000xf32>
    %cst_7 = arith.constant 0.707106769 : f32
    %9 = vector.broadcast %cst_7 : f32 to vector<8x1000xf32>
    %10 = arith.mulf %6, %9 : vector<8x1000xf32>
    %11 = math.erf %10 : vector<8x1000xf32>
    %cst_8 = arith.constant 1.000000e+00 : f32
    %12 = vector.broadcast %cst_8 : f32 to vector<8x1000xf32>
    %13 = arith.addf %12, %11 : vector<8x1000xf32>
    %14 = arith.mulf %8, %13 : vector<8x1000xf32>
    %15 = vector.extract_strided_slice %14 {offsets = [0, 0], sizes = [8, 200], strides = [1, 1]} : vector<8x1000xf32> to vector<8x200xf32>
    %16 = vector.extract_strided_slice %14 {offsets = [0, 200], sizes = [8, 200], strides = [1, 1]} : vector<8x1000xf32> to vector<8x200xf32>
    %17 = vector.extract_strided_slice %14 {offsets = [0, 400], sizes = [8, 200], strides = [1, 1]} : vector<8x1000xf32> to vector<8x200xf32>
    %18 = vector.extract_strided_slice %14 {offsets = [0, 600], sizes = [8, 200], strides = [1, 1]} : vector<8x1000xf32> to vector<8x200xf32>
    %19 = vector.extract_strided_slice %14 {offsets = [0, 800], sizes = [8, 200], strides = [1, 1]} : vector<8x1000xf32> to vector<8x200xf32>
    %20 = tpu.concatenate %15, %16, %17, %18, %19 in 0 : vector<8x200xf32>, vector<8x200xf32>, vector<8x200xf32>, vector<8x200xf32>, vector<8x200xf32> -> vector<40x200xf32>
    %c0_9 = arith.constant 0 : index
    %c0_10 = arith.constant 0 : index
    %21 = vector.load %arg4[%c0_9, %c0_10] : memref<8x40xf32, #tpu.memory_space<vmem>>, vector<8x40xf32>
    %cst_11 = arith.constant dense<0.000000e+00> : vector<8x200xf32>
    %22 = tpu.matmul %21, %20, %cst_11 {dimension_numbers = #tpu.dot_dimension_numbers<[1], [0], [0], [1], [0, 0, 1, 1], [], []>} : vector<8x40xf32>, vector<40x200xf32>, vector<8x200xf32> -> vector<8x200xf32>
    %c0_12 = arith.constant 0 : index
    %c0_13 = arith.constant 0 : index
    %23 = vector.load %arg5[%c0_12, %c0_13] : memref<8x1xf32, #tpu.memory_space<vmem>>, vector<8x1xf32>
    %24 = vector.broadcast %23 : vector<8x1xf32> to vector<8x200xf32>
    %25 = arith.addf %22, %24 : vector<8x200xf32>
    %cst_14 = arith.constant 5.000000e-01 : f32
    %26 = vector.broadcast %cst_14 : f32 to vector<8x200xf32>
    %27 = arith.mulf %26, %25 : vector<8x200xf32>
    %cst_15 = arith.constant 0.707106769 : f32
    %28 = vector.broadcast %cst_15 : f32 to vector<8x200xf32>
    %29 = arith.mulf %25, %28 : vector<8x200xf32>
    %30 = math.erf %29 : vector<8x200xf32>
    %cst_16 = arith.constant 1.000000e+00 : f32
    %31 = vector.broadcast %cst_16 : f32 to vector<8x200xf32>
    %32 = arith.addf %31, %30 : vector<8x200xf32>
    %33 = arith.mulf %27, %32 : vector<8x200xf32>
    %34 = vector.extract_strided_slice %33 {offsets = [0, 0], sizes = [8, 40], strides = [1, 1]} : vector<8x200xf32> to vector<8x40xf32>
    %35 = vector.extract_strided_slice %33 {offsets = [0, 40], sizes = [8, 40], strides = [1, 1]} : vector<8x200xf32> to vector<8x40xf32>
    %36 = vector.extract_strided_slice %33 {offsets = [0, 80], sizes = [8, 40], strides = [1, 1]} : vector<8x200xf32> to vector<8x40xf32>
    %37 = vector.extract_strided_slice %33 {offsets = [0, 120], sizes = [8, 40], strides = [1, 1]} : vector<8x200xf32> to vector<8x40xf32>
    %38 = vector.extract_strided_slice %33 {offsets = [0, 160], sizes = [8, 40], strides = [1, 1]} : vector<8x200xf32> to vector<8x40xf32>
    %39 = tpu.concatenate %34, %35, %36, %37, %38 in 0 : vector<8x40xf32>, vector<8x40xf32>, vector<8x40xf32>, vector<8x40xf32>, vector<8x40xf32> -> vector<40x40xf32>
    %c0_17 = arith.constant 0 : index
    %c0_18 = arith.constant 0 : index
    %40 = vector.load %arg6[%c0_17, %c0_18] : memref<8x40xf32, #tpu.memory_space<vmem>>, vector<8x40xf32>
    %cst_19 = arith.constant dense<0.000000e+00> : vector<8x40xf32>
    %41 = tpu.matmul %40, %39, %cst_19 {dimension_numbers = #tpu.dot_dimension_numbers<[1], [0], [0], [1], [0, 0, 1, 1], [], []>} : vector<8x40xf32>, vector<40x40xf32>, vector<8x40xf32> -> vector<8x40xf32>
    %c0_20 = arith.constant 0 : index
    %c0_21 = arith.constant 0 : index
    %42 = vector.load %arg7[%c0_20, %c0_21] : memref<8x1xf32, #tpu.memory_space<vmem>>, vector<8x1xf32>
    %43 = vector.broadcast %42 : vector<8x1xf32> to vector<8x40xf32>
    %44 = arith.addf %41, %43 : vector<8x40xf32>
    %cst_22 = arith.constant 5.000000e-01 : f32
    %45 = vector.broadcast %cst_22 : f32 to vector<8x40xf32>
    %46 = arith.mulf %45, %44 : vector<8x40xf32>
    %cst_23 = arith.constant 0.707106769 : f32
    %47 = vector.broadcast %cst_23 : f32 to vector<8x40xf32>
    %48 = arith.mulf %44, %47 : vector<8x40xf32>
    %49 = math.erf %48 : vector<8x40xf32>
    %cst_24 = arith.constant 1.000000e+00 : f32
    %50 = vector.broadcast %cst_24 : f32 to vector<8x40xf32>
    %51 = arith.addf %50, %49 : vector<8x40xf32>
    %52 = arith.mulf %46, %51 : vector<8x40xf32>
    %53 = vector.extract_strided_slice %52 {offsets = [0, 0], sizes = [8, 8], strides = [1, 1]} : vector<8x40xf32> to vector<8x8xf32>
    %54 = vector.extract_strided_slice %52 {offsets = [0, 8], sizes = [8, 8], strides = [1, 1]} : vector<8x40xf32> to vector<8x8xf32>
    %55 = vector.extract_strided_slice %52 {offsets = [0, 16], sizes = [8, 8], strides = [1, 1]} : vector<8x40xf32> to vector<8x8xf32>
    %56 = vector.extract_strided_slice %52 {offsets = [0, 24], sizes = [8, 8], strides = [1, 1]} : vector<8x40xf32> to vector<8x8xf32>
    %57 = vector.extract_strided_slice %52 {offsets = [0, 32], sizes = [8, 8], strides = [1, 1]} : vector<8x40xf32> to vector<8x8xf32>
    %58 = tpu.concatenate %53, %54, %55, %56, %57 in 0 : vector<8x8xf32>, vector<8x8xf32>, vector<8x8xf32>, vector<8x8xf32>, vector<8x8xf32> -> vector<40x8xf32>
    %c0_25 = arith.constant 0 : index
    %c0_26 = arith.constant 0 : index
    %59 = vector.load %arg8[%c0_25, %c0_26] : memref<8x40xf32, #tpu.memory_space<vmem>>, vector<8x40xf32>
    %cst_27 = arith.constant dense<0.000000e+00> : vector<8x8xf32>
    %60 = tpu.matmul %59, %58, %cst_27 {dimension_numbers = #tpu.dot_dimension_numbers<[1], [0], [0], [1], [0, 0, 1, 1], [], []>} : vector<8x40xf32>, vector<40x8xf32>, vector<8x8xf32> -> vector<8x8xf32>
    %c0_28 = arith.constant 0 : index
    %c0_29 = arith.constant 0 : index
    %61 = vector.load %arg9[%c0_28, %c0_29] : memref<8x1xf32, #tpu.memory_space<vmem>>, vector<8x1xf32>
    %62 = vector.broadcast %61 : vector<8x1xf32> to vector<8x8xf32>
    %63 = arith.addf %60, %62 : vector<8x8xf32>
    %cst_30 = arith.constant 5.000000e-01 : f32
    %64 = vector.broadcast %cst_30 : f32 to vector<8x8xf32>
    %65 = arith.mulf %64, %63 : vector<8x8xf32>
    %cst_31 = arith.constant 0.707106769 : f32
    %66 = vector.broadcast %cst_31 : f32 to vector<8x8xf32>
    %67 = arith.mulf %63, %66 : vector<8x8xf32>
    %68 = math.erf %67 : vector<8x8xf32>
    %cst_32 = arith.constant 1.000000e+00 : f32
    %69 = vector.broadcast %cst_32 : f32 to vector<8x8xf32>
    %70 = arith.addf %69, %68 : vector<8x8xf32>
    %71 = arith.mulf %65, %70 : vector<8x8xf32>
    %72 = vector.extract_strided_slice %71 {offsets = [0, 0], sizes = [8, 5], strides = [1, 1]} : vector<8x8xf32> to vector<8x5xf32>
    %73 = vector.extract_strided_slice %71 {offsets = [0, 1], sizes = [8, 5], strides = [1, 1]} : vector<8x8xf32> to vector<8x5xf32>
    %74 = vector.extract_strided_slice %71 {offsets = [0, 2], sizes = [8, 5], strides = [1, 1]} : vector<8x8xf32> to vector<8x5xf32>
    %75 = vector.extract_strided_slice %71 {offsets = [0, 3], sizes = [8, 5], strides = [1, 1]} : vector<8x8xf32> to vector<8x5xf32>
    %76 = tpu.concatenate %72, %73, %74, %75 in 0 : vector<8x5xf32>, vector<8x5xf32>, vector<8x5xf32>, vector<8x5xf32> -> vector<32x5xf32>
    %c0_33 = arith.constant 0 : index
    %c0_34 = arith.constant 0 : index
    %77 = vector.load %arg10[%c0_33, %c0_34] : memref<8x32xf32, #tpu.memory_space<vmem>>, vector<8x32xf32>
    %cst_35 = arith.constant dense<0.000000e+00> : vector<8x5xf32>
    %78 = tpu.matmul %77, %76, %cst_35 {dimension_numbers = #tpu.dot_dimension_numbers<[1], [0], [0], [1], [0, 0, 1, 1], [], []>} : vector<8x32xf32>, vector<32x5xf32>, vector<8x5xf32> -> vector<8x5xf32>
    %c0_36 = arith.constant 0 : index
    %c0_37 = arith.constant 0 : index
    %79 = vector.load %arg11[%c0_36, %c0_37] : memref<8x1xf32, #tpu.memory_space<vmem>>, vector<8x1xf32>
    %80 = vector.broadcast %79 : vector<8x1xf32> to vector<8x5xf32>
    %81 = arith.addf %78, %80 : vector<8x5xf32>
    %c0_38 = arith.constant 0 : index
    %c0_39 = arith.constant 0 : index
    %c0_40 = arith.constant 0 : index
    %82 = vector.load %arg12[%c0_38, %c0_39, %c0_40] : memref<1x8x5xf32, #tpu.memory_space<vmem>>, vector<1x8x5xf32>
    %83 = vector.shape_cast %82 : vector<1x8x5xf32> to vector<8x5xf32>
    %84 = vector.shape_cast %81 : vector<8x5xf32> to vector<1x8x5xf32>
    tpu.vector_store %arg12[%c0_38, %c0_39, %c0_40], %84 {strides = array<i32>} : memref<1x8x5xf32, #tpu.memory_space<vmem>>, vector<1x8x5xf32>,
    return
  }
  func.func @transform_0(%arg0: i32) -> (i32, i32, i32) {
    %c0_i32 = arith.constant 0 : i32
    %c0_i32_0 = arith.constant 0 : i32
    %c0_i32_1 = arith.constant 0 : i32
    return %arg0, %c0_i32, %c0_i32_0 : i32, i32, i32
  }
  func.func @transform_1(%arg0: i32) -> (i32, i32) {
    %c0_i32 = arith.constant 0 : i32
    %c0_i32_0 = arith.constant 0 : i32
    %c0_i32_1 = arith.constant 0 : i32
    return %c0_i32, %c0_i32_0 : i32, i32
  }
  func.func @transform_2(%arg0: i32) -> (i32, i32) {
    %c0_i32 = arith.constant 0 : i32
    %c0_i32_0 = arith.constant 0 : i32
    %c0_i32_1 = arith.constant 0 : i32
    return %c0_i32, %c0_i32_0 : i32, i32
  }
  func.func @transform_3(%arg0: i32) -> (i32, i32) {
    %c0_i32 = arith.constant 0 : i32
    %c0_i32_0 = arith.constant 0 : i32
    %c0_i32_1 = arith.constant 0 : i32
    return %c0_i32, %c0_i32_0 : i32, i32
  }
  func.func @transform_4(%arg0: i32) -> (i32, i32) {
    %c0_i32 = arith.constant 0 : i32
    %c0_i32_0 = arith.constant 0 : i32
    %c0_i32_1 = arith.constant 0 : i32
    return %c0_i32, %c0_i32_0 : i32, i32
  }
  func.func @transform_5(%arg0: i32) -> (i32, i32) {
    %c0_i32 = arith.constant 0 : i32
    %c0_i32_0 = arith.constant 0 : i32
    %c0_i32_1 = arith.constant 0 : i32
    return %c0_i32, %c0_i32_0 : i32, i32
  }
  func.func @transform_6(%arg0: i32) -> (i32, i32) {
    %c0_i32 = arith.constant 0 : i32
    %c0_i32_0 = arith.constant 0 : i32
    %c0_i32_1 = arith.constant 0 : i32
    return %c0_i32, %c0_i32_0 : i32, i32
  }
  func.func @transform_7(%arg0: i32) -> (i32, i32) {
    %c0_i32 = arith.constant 0 : i32
    %c0_i32_0 = arith.constant 0 : i32
    %c0_i32_1 = arith.constant 0 : i32
    return %c0_i32, %c0_i32_0 : i32, i32
  }
  func.func @transform_8(%arg0: i32) -> (i32, i32) {
    %c0_i32 = arith.constant 0 : i32
    %c0_i32_0 = arith.constant 0 : i32
    %c0_i32_1 = arith.constant 0 : i32
    return %c0_i32, %c0_i32_0 : i32, i32
  }
  func.func @transform_9(%arg0: i32) -> (i32, i32) {
    %c0_i32 = arith.constant 0 : i32
    %c0_i32_0 = arith.constant 0 : i32
    %c0_i32_1 = arith.constant 0 : i32
    return %c0_i32, %c0_i32_0 : i32, i32
  }
  func.func @transform_10(%arg0: i32) -> (i32, i32) {
    %c0_i32 = arith.constant 0 : i32
    %c0_i32_0 = arith.constant 0 : i32
    %c0_i32_1 = arith.constant 0 : i32
    return %c0_i32, %c0_i32_0 : i32, i32
  }
  func.func @transform_11(%arg0: i32) -> (i32, i32, i32) {
    %c0_i32 = arith.constant 0 : i32
    %c0_i32_0 = arith.constant 0 : i32
    %c0_i32_1 = arith.constant 0 : i32
    return %arg0, %c0_i32, %c0_i32_0 : i32, i32, i32
  }
}

</mosaic_0001>

<bundles_post_ra>
// kernel: brain_wave_linker_pallas.1
= control target key start
LH: loop header
LB: loop body
LE: loop exit
PB: predicated region body
PF: predicated region fallthrough
CT: control target
= control target key end

     0   :  { %s1497_s17 = smov 0   ;;  %s1603_s0 = inlined_call_operand.vmem [shape: f32[2,4,1000], index: 0, kind: input, shape index: {}]   ;;  %s1604_s1 = inlined_call_operand.vmem [shape: f32[8,4], index: 1, kind: input, shape index: {}]   ;;  %s1605_s2 = inlined_call_operand.vmem [shape: f32[8,1], index: 2, kind: input, shape index: {}]   ;;  %s1606_s3 = inlined_call_operand.vmem [shape: f32[8,40], index: 3, kind: input, shape index: {}]   ;;  %s1607_s4 = inlined_call_operand.vmem [shape: f32[8,1], index: 4, kind: input, shape index: {}]   ;;  %s1608_s5 = inlined_call_operand.vmem [shape: f32[8,40], index: 5, kind: input, shape index: {}]   ;;  %s1609_s6 = inlined_call_operand.vmem [shape: f32[8,1], index: 6, kind: input, shape index: {}]   ;;  %s1610_s7 = inlined_call_operand.vmem [shape: f32[8,40], index: 7, kind: input, shape index: {}]   ;;  %s1611_s8 = inlined_call_operand.vmem [shape: f32[8,1], index: 8, kind: input, shape index: {}]   ;;  %s1612_s9 = inlined_call_operand.vmem [shape: f32[8,32], index: 9, kind: input, shape index: {}]   ;;  %s1613_s10 = inlined_call_operand.vmem [shape: f32[8,1], index: 10, kind: input, shape index: {}]   ;;  %s1614_s11 = inlined_call_operand.vmem [shape: f32[2,8,5], index: 11, kind: output, shape index: {}]  }
   0x1 LB: > { %s1232_s18 = sadd.s32 4294967295, %s1419_s17   ;;  %p1236_p0 = scmp.ge.s32.totalorder %s1419_s17, 1  ;;  %s1419_s17 = sphi %s1497_s17, %s21_s17  }
   0x2   : > { %p337_p1 = scmp.lt.s32.totalorder %s1419_s17, 3 }
   0x4   : > { %p338_p2 = pnand %p1236_p0, %p337_p1 }
   0x5   : > { %p376_p3 = scmp.lt.s32.totalorder (!%p338_p2), %s1232_s18, 1  ;;  %v1421_v0 = vmov (!%p338_p2), 0.0   ;;  %v390_v1 = vld [vmem:[%s1605_s2] sm:$0xff] (!%p338_p2)  ;;  %v1422_v2 = vmov (!%p338_p2), 0   ;;  %vm408_vm0 = vcmask (!%p338_p2), 1043456   ;;  %vm404_vm1 = vcmask (!%p338_p2), 31744  }
   0x6   : > { %341 = sbr.rel (%p338_p2) target bundleno = 1673 (0x689), region = 64  ;;  %489 = vmatprep.mubr.f32.mxu0 (!%p338_p2), %v1421_v0  ;;  %560 = vmatprep.mubr.f32.mxu1 (!%p338_p2), %v1421_v0  ;;  %v385_v9 = vld [vmem:[%s1604_s1] sm:$0xff] (!%p338_p2)  ;;  %s1423_s27 = smov (!%p338_p2), 56   ;;  %vm758_vm2 = vcmask (!%p338_p2), 457728   ;;  %vm780_vm3 = vcmask (!%p338_p2), 326656   ;;  %vm768_vm4 = vcmask (!%p338_p2), 916480  }
   0x7   : > { %1363 = vset.pattern.permute.xlu0 (!%p338_p2), %v1422_v2  ;;  %1384 = vset.pattern.permute.xlu1 (!%p338_p2), %v1422_v2  ;;  %s1424_s28 = smov (!%p338_p2), 112   ;;  %s1425_s29 = smov (!%p338_p2), 40   ;;  %v795_v2 = vld [vmem:[%s1607_s4] sm:$0xff] (!%p338_p2)  ;;  %vm790_vm5 = vcmask (!%p338_p2), 785408   ;;  %vm1429_vm6 = vmmov (!%p338_p2), 0   ;;  %vm897_vm7 = vcmask (!%p338_p2), 64512  }
   0x8   : > { %393 = vperm.xlu0 (!%p338_p2), %1363, %v390_v1   ;;  %s1426_s30 = smov (!%p338_p2), 96   ;;  %s1428_s16 = smov (!%p338_p2), 88   ;;  %vm1103_vm8 = vcmask (!%p338_p2), 261120   ;;  %vm1177_vm9 = vcmask (!%p338_p2), 39936  }
   0x9   : > { %s1430_s19 = smov (!%p338_p2), 8   ;;  %s1431_s20 = smov (!%p338_p2), 48  }
   0xa   : > { %s1432_s25 = smov (!%p338_p2), 120   ;;  %s1433_s26 = smov (!%p338_p2), 104  }
   0xb   : > { %s1434_s12 = smov (!%p338_p2), 126   ;;  %s1435_s13 = smov (!%p338_p2), 127  }
   0xd   : > { %s1616_s18 = smov (!%p376_p3, %s1232_s18), 1 }
   0xe   : > { %s1258_s21 = sshll.u32 %s1616_s18, 5 }
   0xf   : > { %s380_s24 = scalar_lea.vmem %s1603_s0, %s1258_s21  ;;  %s1239_s21 = sshll.u32 %s1616_s18, 3 }
  0x10   : > { %v386_v3 = vld [vmem:[%s380_s24] sm:$0xff]  ;;  %v387_v4 = vld [vmem:[%s380_s24 + $0x8] sm:$0xff]  ;;  %v388_v5 = vld [vmem:[%s380_s24 + $0x10] sm:$0xff] }
  0x11   : > { %v400_v6 = vcombine.high %v386_v3, %v386_v3  ;;  %v401_v7 = vcombine.high %v387_v4, %v387_v4  ;;  %v389_v8 = vld [vmem:[%s380_s24 + $0x18] sm:$0xff]  ;;  %v402_v10 = vcombine.high %v388_v5, %v388_v5  ;;  %s384_s24 = scalar_lea.vmem %s1614_s11, %s1239_s21 }
  0x12   : > { %v403_v11 = vcombine.high %v389_v8, %v389_v8 }
  0x13   : > { %1240 = vmatprep.subr.msk.mxu0 %vm408_vm0, %v400_v6  ;;  %1243 = vmatprep.subr.msk.mxu1 %vm408_vm0, %v401_v7 }
  0x14   : > { %1241 = vmatpush1.msk.msra.mxu0 %vm408_vm0, %v386_v3  ;;  %1244 = vmatpush1.msk.msra.mxu1 %vm408_vm0, %v387_v4 }
  0x15   : > { %1242 = vmatmul.mubr.msk.f32.vlgmr.msra.gmra.mrb[0].mxu0 %vm404_vm1, %v385_v9  ;;  %1245 = vmatmul.mubr.msk.f32.vlgmr.msra.gmra.mrb[0].mxu1 %vm404_vm1, %v385_v9 }
  0x16   : > { %1246 = vmatprep.subr.msk.mxu0 %vm408_vm0, %v402_v10  ;;  %1249 = vmatprep.subr.msk.mxu1 %vm408_vm0, %v403_v11 }
  0x17   : > { %1247 = vmatpush1.msk.msra.mxu0 %vm408_vm0, %v388_v5  ;;  %1250 = vmatpush1.msk.msra.mxu1 %vm408_vm0, %v389_v8 }
  0x18   : > { %631 = vmatprep.mubr.f32.mxu0 %v1421_v0  ;;  %702 = vmatprep.mubr.f32.mxu1 %v1421_v0 }
  0x19   : > { %1248 = vmatmul.mubr.msk.f32.vlgmr.msra.gmra.mrb[2].mxu0 %vm404_vm1, %v385_v9  ;;  %1251 = vmatmul.mubr.msk.f32.vlgmr.msra.gmra.mrb[2].mxu1 %vm404_vm1, %v385_v9 }
  0x1a   : > { %868 = vmatprep.mubr.f32.mxu0 %v1421_v0  ;;  %1286 = vmatprep.mubr.msk.f32.mxu1 %vm1429_vm6, %v1421_v0 }
  0x87   : > { %v1534_v12 = vpop.permute.xlu0 %393 }
  0xe8   : > { %v1536_v13 = vpop.f32.mrb[0].mxu0  ;;  %v562_v14 = vpop.f32.mrb[0].mxu1 }
  0xe9   : > { %v563_v15 = vadd.f32 %v562_v14, %v1534_v12  ;;  %v493_v16 = vpop.f32.mrb[1].mxu0  ;;  %v564_v17 = vpop.f32.mrb[1].mxu1  ;;  %v492_v4 = vadd.f32 %v1536_v13, %v1534_v12 }
  0xea   : > { %v494_v18 = vadd.f32 %v493_v16, %v1534_v12  ;;  %v565_v19 = vadd.f32 %v564_v17, %v1534_v12 }
  0xeb   : > { %v719_v20 = vmul.f32 0.70710677, %v563_v15  ;;  %v711_v37 = vmul.f32 0.5, %v563_v15  ;;  %v717_v5 = vmul.f32 0.70710677, %v492_v4  ;;  %v709_v8 = vmul.f32 0.5, %v492_v4 }
  0xec   : > { %v718_v21 = vmul.f32 0.70710677, %v494_v18  ;;  %v720_v22 = vmul.f32 0.70710677, %v565_v19  ;;  %v633_v23 = vpop.f32.mrb[2].mxu0  ;;  %v704_v24 = vpop.f32.mrb[2].mxu1 }
  0xed   : > { %1389 = verf.f32 %v719_v20  ;;  %v634_v25 = vadd.f32 %v633_v23, %v1534_v12  ;;  %v705_v26 = vadd.f32 %v704_v24, %v1534_v12  ;;  %v635_v27 = vpop.f32.mrb[3].mxu0  ;;  %v706_v28 = vpop.f32.mrb[3].mxu1  ;;  %v710_v40 = vmul.f32 0.5, %v494_v18 }
  0xee   : > { %1391 = verf.f32 %v718_v21  ;;  %v636_v29 = vadd.f32 %v635_v27, %v1534_v12  ;;  %v707_v33 = vadd.f32 %v706_v28, %v1534_v12  ;;  %v712_v43 = vmul.f32 0.5, %v565_v19 }
  0xef   : > { %1393 = verf.f32 %v720_v22  ;;  %v721_v30 = vmul.f32 0.70710677, %v634_v25  ;;  %v723_v31 = vmul.f32 0.70710677, %v705_v26  ;;  %v713_v49 = vmul.f32 0.5, %v634_v25 }
  0xf0   : > { %v722_v32 = vmul.f32 0.70710677, %v636_v29  ;;  %v724_v34 = vmul.f32 0.70710677, %v707_v33  ;;  %v715_v52 = vmul.f32 0.5, %v705_v26  ;;  %v714_v55 = vmul.f32 0.5, %v636_v29 }
  0xf1   : > { %1395 = verf.f32 %v721_v30  ;;  %v716_v1 = vmul.f32 0.5, %v707_v33 }
  0xf2   : > { %1397 = verf.f32 %v723_v31 }
  0xf3   : > { %1399 = verf.f32 %v722_v32  ;;  %v794_v32 = vld [vmem:[%s1606_s3] sm:$0xff] }
  0xf4   : > { %1401 = verf.f32 %v724_v34 }
  0xf5   : > { %1403 = verf.f32 %v717_v5 }
  0xf7   : > { %v1390_v35 = vpop.eup %1389 }
  0xf8   : > { %v1392_v36 = vpop.eup %1391  ;;  %v735_v38 = vadd.f32 1.0, %v1390_v35 }
  0xf9   : > { %v1394_v39 = vpop.eup %1393  ;;  %v734_v41 = vadd.f32 1.0, %v1392_v36 }
  0xfa   : > { %v743_v42 = vmul.f32 %v735_v38, %v711_v37  ;;  %v736_v44 = vadd.f32 1.0, %v1394_v39 }
  0xfb   : > { %v1396_v45 = vpop.eup %1395  ;;  %v742_v46 = vmul.f32 %v734_v41, %v710_v40  ;;  %v1427_v41 = vmov 0.0|0.0  }
  0xfc   : > { %v1398_v47 = vpop.eup %1397  ;;  %v744_v48 = vmul.f32 %v736_v44, %v712_v43  ;;  %v737_v50 = vadd.f32 1.0, %v1396_v45  ;;  %1321 = vmatprep.subr.bf16.mxu1 %v1427_v41 }
  0xfd   : > { %v1400_v51 = vpop.eup %1399  ;;  %v739_v53 = vadd.f32 1.0, %v1398_v47  ;;  %752 = vrot.lane.b32.xlu1 %v742_v46, %s1423_s27 }
  0xfe   : > { %v745_v54 = vmul.f32 %v737_v50, %v713_v49  ;;  %v738_v56 = vadd.f32 1.0, %v1400_v51  ;;  %v1364_v57 = vpack.i.bf16 %v744_v48, %v743_v42  ;;  %v1402_v62 = vpop.eup %1401  ;;  %v904_v51 = vld [vmem:[%s1609_s6] sm:$0xff] }
  0xff   : > { %v747_v58 = vmul.f32 %v739_v53, %v715_v52  ;;  %v740_v63 = vadd.f32 1.0, %v1402_v62  ;;  %v1404_v6 = vpop.eup %1403 }
 0x100   : > { %v746_v59 = vmul.f32 %v738_v56, %v714_v55  ;;  %1365 = vrot.lane.b32.xlu0 %v1364_v57, %s1423_s27  ;;  %v1369_v60 = vpack.i.bf16 %v745_v54, %v744_v48  ;;  %v733_v7 = vadd.f32 1.0, %v1404_v6 }
 0x101   : > { %v748_v3 = vmul.f32 %v740_v63, %v716_v1 }
 0x102   : > { %v1374_v61 = vpack.i.bf16 %v747_v58, %v746_v59  ;;  %v741_v15 = vmul.f32 %v733_v7, %v709_v8  ;;  %v1002_v8 = vld [vmem:[%s1611_s8] sm:$0xff] }
 0x104   : > { %1370 = vrot.lane.b32.xlu0 %v1369_v60, %s1424_s28  ;;  %1375 = vrot.lane.b32.xlu1 %v1374_v61, %s1425_s29  ;;  %v903_v60 = vld [vmem:[%s1608_s5] sm:$0xff] }
 0x108   : > { %786 = vrot.lane.b32.xlu0 %v747_v58, %s1426_s30  ;;  %774 = vrot.lane.b32.xlu1 %v745_v54, %s1425_s29 }
 0x10c   : > { %798 = vperm.xlu0 %1363, %v795_v2   ;;  %788 = vrot.lane.b32.xlu1 %v748_v3, %s1426_s30 }
 0x16f   : > { %v753_v9 = vpop.permute.xlu1 %752 }
 0x172   : > { %v1366_v10 = vpop.permute.xlu0 %1365 }
 0x173   : > { %v1368_v11 = vunpack.i.h.bf16 %v1366_v10  ;;  %v1367_v14 = vunpack.i.l.bf16 %v1366_v10 }
 0x175   : > { %v759_v16 = vsel %vm758_vm2, %v753_v9, %v1367_v14  ;;  %v760_v17 = vsel %vm758_vm2, %v1367_v14, %v1368_v11 }
 0x176   : > { %v1315_v18 = vpack.c.bf16 %v759_v16, %v741_v15  ;;  %v1371_v19 = vpop.permute.xlu0 %1370  ;;  %v1376_v20 = vpop.permute.xlu1 %1375  ;;  %v1313_v21 = vpack.c.bf16 %v760_v17, %v742_v46  ;;  %v1001_v16 = vld [vmem:[%s1610_s7] sm:$0xff] }
 0x177   : > { %v1373_v22 = vunpack.i.h.bf16 %v1371_v19  ;;  %v1372_v12 = vunpack.i.l.bf16 %v1371_v19  ;;  %v1378_v13 = vunpack.i.h.bf16 %v1376_v20  ;;  %v1377_v23 = vunpack.i.l.bf16 %v1376_v20 }
 0x178   : > { %1314 = vmatprep.subr.bf16.mxu0 %v1313_v21 }
 0x179   : > { %1316 = vmatpush1.bf16.msra.mxu0 %v1315_v18  ;;  %v782_v24 = vsel %vm780_vm3, %v1377_v23, %v1378_v13  ;;  %v769_v27 = vsel %vm768_vm4, %v1372_v12, %v1373_v22 }
 0x17a   : > { %v775_v25 = vpop.permute.xlu1 %774  ;;  %v1317_v26 = vpack.c.bf16 %v782_v24, %v1373_v22  ;;  %v787_v31 = vpop.permute.xlu0 %786 }
 0x17b   : > { %v781_v28 = vsel %vm780_vm3, %v775_v25, %v1377_v23 }
 0x17c   : > { %v1319_v29 = vpack.c.bf16 %v781_v28, %v769_v27  ;;  %1318 = vmatprep.subr.bf16.mxu0 %v1317_v26 }
 0x17e   : > { %v789_v30 = vpop.permute.xlu1 %788  ;;  %1320 = vmatpush1.bf16.msra.mxu0 %v1319_v29 }
 0x17f   : > { %812 = vmatprep.subr.mxu0 %v789_v30  ;;  %v791_v33 = vsel %vm790_vm5, %v787_v31, %v789_v30  ;;  %v1096_v30 = vld [vmem:[%s1612_s9] sm:$0xff] }
 0x182   : > { %813 = vmatpush1.msra.mxu0 %v791_v33 }
 0x183   : > { %1252 = vmatmul.mubr.msk.f32.vlgmr.msra.gmra.mrb[4].mxu0 %vm780_vm3, %v794_v32  ;;  %1327 = vmatprep.subr.bf16.mxu0 %v1427_v41 }
 0x184   : > { %1299 = vmatprep.mubr.msk.f32.mxu0 %vm1429_vm6, %v1421_v0 }
 0x18b   : > { %v799_v34 = vpop.permute.xlu0 %798 }
 0x256   : > { %v870_v35 = vpop.f32.mrb[4].mxu0 }
 0x257   : > { %v871_v36 = vadd.f32 %v870_v35, %v799_v34  ;;  %v872_v37 = vpop.f32.mrb[5].mxu0 }
 0x258   : > { %v873_v38 = vadd.f32 %v872_v37, %v799_v34 }
 0x259   : > { %v877_v39 = vmul.f32 0.70710677, %v871_v36  ;;  %v875_v44 = vmul.f32 0.5, %v871_v36 }
 0x25a   : > { %v878_v40 = vmul.f32 0.70710677, %v873_v38  ;;  %v876_v46 = vmul.f32 0.5, %v873_v38 }
 0x25b   : > { %1405 = verf.f32 %v877_v39 }
 0x25c   : > { %1407 = verf.f32 %v878_v40 }
 0x265   : > { %v1406_v42 = vpop.eup %1405 }
 0x266   : > { %v1408_v43 = vpop.eup %1407  ;;  %v881_v45 = vadd.f32 1.0, %v1406_v42 }
 0x267   : > { %v882_v47 = vadd.f32 1.0, %v1408_v43 }
 0x268   : > { %v883_v48 = vmul.f32 %v881_v45, %v875_v44 }
 0x269   : > { %v884_v49 = vmul.f32 %v882_v47, %v876_v46 }
 0x26a   : > { %886 = vrot.lane.b32.xlu1 %v883_v48, %s1428_s16  ;;  %s1436_s16 = smov 125  }
 0x26b   : > { %v1379_v50 = vpack.i.bf16 %v884_v49, %v883_v48 }
 0x26d   : > { %1380 = vrot.lane.b32.xlu0 %v1379_v50, %s1430_s19 }
 0x26e   : > { %889 = vrot.lane.b32.xlu1 %v883_v48, %s1431_s20 }
 0x271   : > { %900 = vrot.lane.b32.xlu0 %v884_v49, %s1426_s30 }
 0x272   : > { %907 = vperm.xlu1 %1384, %v904_v51  }
 0x2dc   : > { %v887_v52 = vpop.permute.xlu1 %886 }
 0x2dd   : > { %v1322_v53 = vpack.c.bf16 %v887_v52, %v883_v48 }
 0x2df   : > { %v1381_v54 = vpop.permute.xlu0 %1380  ;;  %1323 = vmatpush3.bf16.msra.mxu1 %v1322_v53 }
 0x2e0   : > { %v1383_v55 = vunpack.i.h.bf16 %v1381_v54  ;;  %v1382_v56 = vunpack.i.l.bf16 %v1381_v54  ;;  %1324 = vmatprep.subr.bf16.mxu1 %v1427_v41  ;;  %v890_v58 = vpop.permute.xlu1 %889 }
 0x2e2   : > { %v898_v57 = vsel %vm897_vm7, %v1382_v56, %v1383_v55 }
 0x2e3   : > { %v1325_v59 = vpack.c.bf16 %v898_v57, %v890_v58  ;;  %v901_v61 = vpop.permute.xlu0 %900 }
 0x2e5   : > { %1326 = vmatpush3.bf16.msra.mxu1 %v1325_v59 }
 0x2e6   : > { %1284 = vmatprep.subr.mxu1 %v1421_v0 }
 0x2e9   : > { %1285 = vmatpush3.msra.mxu1 %v901_v61 }
 0x2ea   : > { %1287 = vmatmul.mubr.msk.f32.vlgmr.msra.gmra.mrb[4].mxu1 %vm780_vm3, %v903_v60  ;;  %1333 = vmatprep.subr.bf16.mxu1 %v1427_v41 }
 0x2eb   : > { %1310 = vmatprep.mubr.msk.f32.mxu1 %vm1429_vm6, %v1421_v0 }
 0x2f1   : > { %v908_v62 = vpop.permute.xlu1 %907 }
 0x3bd   : > { %v979_v63 = vpop.f32.mrb[4].mxu1 }
 0x3be   : > { %v980_v1 = vadd.f32 %v979_v63, %v908_v62  ;;  %v1288_v2 = vpop.f32.mrb[5].mxu1 }
 0x3c0   : > { %v984_v3 = vmul.f32 0.70710677, %v980_v1  ;;  %v983_v5 = vmul.f32 0.5, %v980_v1 }
 0x3c2   : > { %1409 = verf.f32 %v984_v3 }
 0x3cc   : > { %v1410_v4 = vpop.eup %1409 }
 0x3cd   : > { %v986_v6 = vadd.f32 1.0, %v1410_v4 }
 0x3cf   : > { %v987_v7 = vmul.f32 %v986_v6, %v983_v5 }
 0x3d1   : > { %992 = vrot.lane.b32.xlu1 %v987_v7, %s1424_s28  ;;  %989 = vrot.lane.b32.xlu0 %v987_v7, %s1432_s25 }
 0x3d5   : > { %998 = vrot.lane.b32.xlu1 %v987_v7, %s1426_s30  ;;  %995 = vrot.lane.b32.xlu0 %v987_v7, %s1433_s26 }
 0x3d9   : > { %1005 = vperm.xlu0 %1363, %v1002_v8  }
 0x443   : > { %v990_v9 = vpop.permute.xlu0 %989  ;;  %v993_v11 = vpop.permute.xlu1 %992 }
 0x444   : > { %v1328_v10 = vpack.c.bf16 %v990_v9, %v987_v7 }
 0x446   : > { %1329 = vmatpush3.bf16.msra.mxu0 %v1328_v10 }
 0x447   : > { %v996_v14 = vpop.permute.xlu0 %995  ;;  %1330 = vmatprep.subr.bf16.mxu0 %v1427_v41  ;;  %v999_v17 = vpop.permute.xlu1 %998 }
 0x448   : > { %v1331_v15 = vpack.c.bf16 %v996_v14, %v993_v11 }
 0x44a   : > { %1332 = vmatpush3.bf16.msra.mxu0 %v1331_v15 }
 0x44b   : > { %1297 = vmatprep.subr.mxu0 %v1421_v0  ;;  %v1097_v0 = vld [vmem:[%s1613_s10] sm:$0xff] }
 0x44e   : > { %1298 = vmatpush3.msra.mxu0 %v999_v17 }
 0x44f   : > { %1300 = vmatmul.mubr.msk.f32.vlgmr.msra.gmra.mrb[6].mxu0 %vm780_vm3, %v1001_v16 }
 0x458   : > { %v1006_v18 = vpop.permute.xlu0 %1005 }
 0x522   : > { %v1077_v19 = vpop.f32.mrb[6].mxu0 }
 0x523   : > { %v1078_v20 = vadd.f32 %v1077_v19, %v1006_v18  ;;  %v1301_v21 = vpop.f32.mrb[7].mxu0 }
 0x525   : > { %v1082_v22 = vmul.f32 0.70710677, %v1078_v20  ;;  %v1081_v13 = vmul.f32 0.5, %v1078_v20 }
 0x527   : > { %1411 = verf.f32 %v1082_v22 }
 0x531   : > { %v1412_v12 = vpop.eup %1411 }
 0x532   : > { %v1084_v23 = vadd.f32 1.0, %v1412_v12 }
 0x534   : > { %v1085_v24 = vmul.f32 %v1084_v23, %v1081_v13 }
 0x536   : > { %1090 = vrot.lane.b32.xlu0 %v1085_v24, %s1434_s12  ;;  %1087 = vrot.lane.b32.xlu1 %v1085_v24, %s1435_s13 }
 0x53a   : > { %1100 = vperm.xlu0 %1363, %v1097_v0   ;;  %1093 = vrot.lane.b32.xlu1 %v1085_v24, %s1436_s16 }
 0x5a8   : > { %v1088_v25 = vpop.permute.xlu1 %1087  ;;  %v1091_v27 = vpop.permute.xlu0 %1090 }
 0x5a9   : > { %v1334_v26 = vpack.c.bf16 %v1088_v25, %v1085_v24 }
 0x5ab   : > { %1335 = vmatpush3.bf16.msra.mxu1 %v1334_v26 }
 0x5ac   : > { %v1094_v28 = vpop.permute.xlu1 %1093  ;;  %1336 = vmatprep.subr.bf16.mxu1 %v1427_v41 }
 0x5ad   : > { %v1337_v29 = vpack.c.bf16 %v1094_v28, %v1091_v27 }
 0x5af   : > { %1338 = vmatpush3.bf16.msra.mxu1 %v1337_v29 }
 0x5b2   : > { %1311 = vmatmul.mubr.msk.f32.vlgmr.msra.gmra.mrb[6].mxu1 %vm1103_vm8, %v1096_v30 }
 0x5b9   : > { %v1101_v31 = vpop.permute.xlu0 %1100 }
 0x685   : > { %v1173_v32 = vpop.f32.mrb[6].mxu1 }
 0x686   : > { %v1174_v33 = vadd.f32 %v1173_v32, %v1101_v31  ;;  %v1312_v34 = vpop.f32.mrb[7].mxu1 }
 0x688   : > { %1178 = vst.msk [vmem:[%s384_s24] sm:$0xff] %vm1177_vm9, %v1174_v33 }
 0x689 PF: > { %s21_s17 = sadd.s32 1, %s1419_s17  }
 0x68a   : > { %p18_p4 = scmp.ge.s32.totalorder %s21_s17, 4  }
 0x68c   :  { %20 = sbr.rel (!%p18_p4) target bundleno = 1 (0x1), region = 94 }

</bundles_post_ra>
